<compile_context>
chip_gen: v6e
topology: v6e:2x2x1
jax: 0.10.0
libtpu: 0.0.40
codegen_flags: <defaults>
</compile_context>

<pallas_src>
import jax
import jax.numpy as jnp
from jax import lax
from jax.experimental import pallas as pl
from jax.experimental.pallas import tpu as pltpu


def _round_up(n, m):
    return ((n + m - 1) // m) * m


def _critic_kernel(x_ref, w1_ref, b1_ref, w2_ref, b2_ref, w3_ref, o_ref):
    # x tile arrives in natural (TB, obs_dim) layout; cast to the MXU input
    # dtype in-register (VPU) and contract both operands over their last axis
    # (trans_b form) so the result is already the transposed (128, TB)
    # orientation -> lane-dense (1, TB) output at the end, no relayout.
    x = x_ref[...].astype(w1_ref.dtype)                                   # (TB, D)
    h1 = lax.dot_general(w1_ref[...], x, (((1,), (1,)), ((), ())),
                         preferred_element_type=jnp.float32)              # (128, TB)
    h1 = jnp.maximum(h1 + b1_ref[...], 0.0)                               # bias (128,1)

    # NOTE: h1 is re-rounded to the MXU dtype (bf16 by default) between layers;
    # this matches critic_net_ref's bf16 path.
    h2 = jnp.dot(w2_ref[...], h1.astype(w2_ref.dtype),
                 preferred_element_type=jnp.float32)                      # (64, TB)
    h2 = jnp.maximum(h2 + b2_ref[...], 0.0)

    # 64 -> 1 value head: VPU multiply + sublane reduce (an MXU matmul would
    # use <1/256 of its output columns).  w3 is (64, 1).
    v = jnp.sum(h2 * w3_ref[...], axis=0, keepdims=True)                  # (1, TB)
    o_ref[...] = v.astype(o_ref.dtype)


def critic_net_pallas(x, params, *, use_bf16_inputs=True, max_block_batch=8192):
    """Forward pass of CriticNet.

    x: (batch, obs_dim) f32.  params in PyTorch layout:
       w1 (128, obs_dim), b1 (128,), w2 (64, 128), b2 (64,), w3 (1, 64), b3 (1,).
    Returns (batch, 1) f32.
    """
    w1, b1, w2, b2, w3, b3 = params
    batch, obs_dim = x.shape
    h1_dim, h2_dim = w1.shape[0], w2.shape[0]            # 128, 64

    mm_dtype = jnp.bfloat16 if use_bf16_inputs else jnp.float32

    # Weights / biases, kept tiny and VMEM-resident across the whole grid.
    w1m = w1.astype(mm_dtype)                             # (128, obs_dim)
    w2m = w2.astype(mm_dtype)                             # (64, 128)
    b1c = b1.reshape(h1_dim, 1).astype(jnp.float32)       # (128, 1)
    b2c = b2.reshape(h2_dim, 1).astype(jnp.float32)       # (64, 1)
    w3c = w3.reshape(h2_dim, 1).astype(jnp.float32)       # (64, 1)

    # ---- generation-aware batch tile ------------------------------------
    try:
        vmem_cap = int(getattr(pltpu.get_tpu_info(), "vmem_capacity_bytes",
                               64 << 20))
    except Exception:                                     # non-TPU / old jax
        vmem_cap = 64 << 20                               # conservative (v7x)
    tile_budget = min(vmem_cap // 3, 32 << 20)            # headroom for scratch
    vmem_limit = int(min(vmem_cap // 2, 64 << 20))

    in_isz = jnp.dtype(x.dtype).itemsize
    mm_isz = jnp.dtype(mm_dtype).itemsize
    weight_bytes = sum(int(a.size) * a.dtype.itemsize
                       for a in (w1m, w2m, b1c, b2c, w3c))
    bytes_per_row = (
        2 * obs_dim * in_isz            # double-buffered x tile
        + obs_dim * mm_isz              # in-kernel MXU-dtype copy of x tile
        + h1_dim * 4 + h1_dim * mm_isz  # h1 f32 + MXU-dtype copy
        + h2_dim * 4                    # h2 f32
        + 2 * 8 * 4                     # double-buffered (1, TB) output (8-sublane padded)
    )
    rows = max((tile_budget - weight_bytes) // max(bytes_per_row, 1), 1)
    tb = max(128, min(max_block_batch, (rows // 128) * 128))

    padded128 = _round_up(batch, 128)
    if padded128 >= 2 * 128:
        # >= 2 grid steps so the "parallel" axis shards across both v7x TCs
        # (harmless no-op on the single-TC v5e/v6e).
        tb = min(tb, _round_up(pl.cdiv(padded128, 2), 128))
    tb = min(tb, padded128)

    num_tiles = pl.cdiv(batch, tb)
    out_cols = num_tiles * tb            # full output blocks -> unmasked lane-dense stores

    def const_spec(arr):
        return pl.BlockSpec(arr.shape, lambda i: (0, 0))  # VMEM-resident weights

    flops = 2 * batch * (obs_dim * h1_dim + h1_dim * h2_dim + h2_dim)
    bytes_accessed = (
        int(x.size) * in_isz             # x read once, natural layout, stored dtype
        + weight_bytes
        + out_cols * 4                   # (1, out_cols) f32 output
    )

    out = pl.pallas_call(
        _critic_kernel,
        out_shape=jax.ShapeDtypeStruct((1, out_cols), jnp.float32),
        grid_spec=pltpu.PrefetchScalarGridSpec(
            num_scalar_prefetch=0,
            grid=(num_tiles,),
            in_specs=[
                # x in natural layout; last grid step may be a partial block
                # (extra rows only feed output columns that are sliced off).
                # TODO(synk): if the profile shows exposed x DMA at large TB,
                # add pipeline_mode=pl.Buffered(3) to this spec only.
                pl.BlockSpec((tb, obs_dim), lambda i: (i, 0)),
                const_spec(w1m), const_spec(b1c),
                const_spec(w2m), const_spec(b2c),
                const_spec(w3c),
            ],
            out_specs=pl.BlockSpec((1, tb), lambda i: (0, i)),
        ),
        compiler_params=pltpu.CompilerParams(
            dimension_semantics=("parallel",),
            vmem_limit_bytes=vmem_limit,
        ),
        cost_estimate=pl.CostEstimate(
            flops=flops, transcendentals=0, bytes_accessed=bytes_accessed
        ),
    )(x, w1m, b1c, w2m, b2c, w3c)

    # b3 is a single scalar: add it outside the kernel (cheaper than a padded
    # (8,128) VMEM operand inside).
    return out[0, :batch].reshape(batch, 1) + b3.reshape(1, 1).astype(jnp.float32)


def init_params(key, obs_dim):
    """PyTorch nn.Linear default init, weights kept in PyTorch (out, in) layout."""
    dims = [(obs_dim, 128), (128, 64), (64, 1)]
    params = []
    for fan_in, fan_out in dims:
        key, kw, kb = jax.random.split(key, 3)
        bound = 1.0 / jnp.sqrt(float(fan_in))
        w = jax.random.uniform(kw, (fan_out, fan_in), jnp.float32, -bound, bound)
        b = jax.random.uniform(kb, (fan_out,), jnp.float32, -bound, bound)
        params += [w, b]
    return tuple(params)


def critic_net_ref(x, params, *, use_bf16_inputs=False):
    """Pure-JAX reference matching the kernel's numerics."""
    w1, b1, w2, b2, w3, b3 = params
    if use_bf16_inputs:
        rnd = lambda a: a.astype(jnp.bfloat16).astype(jnp.float32)
        x, w1, w2 = rnd(x), rnd(w1), rnd(w2)
    h = jnp.maximum(x @ w1.T + b1, 0.0)
    if use_bf16_inputs:
        h = h.astype(jnp.bfloat16).astype(jnp.float32)
    h = jnp.maximum(h @ w2.T + b2, 0.0)
    return h @ w3.T + b3


if __name__ == "__main__":
    key = jax.random.PRNGKey(0)
    k_params, k_x1, k_x2 = jax.random.split(key, 3)

    obs_dim = 32
    params = init_params(k_params, obs_dim)

    # Small batch: single (partial) tile.
    x_small = jax.random.normal(k_x1, (8, obs_dim), jnp.float32)
    out = jax.block_until_ready(critic_net_pallas(x_small, params))
    assert out.shape == (8, 1), out.shape
    ref = critic_net_ref(x_small, params, use_bf16_inputs=True)
    assert jnp.allclose(out, ref, atol=1e-4, rtol=1e-4), "mismatch (bf16 path, small batch)"

    # Batch not a multiple of 128: exercises >=2 grid tiles + a partial last x block.
    x_med = jax.random.normal(k_x2, (200, obs_dim), jnp.float32)
    out_med = jax.block_until_ready(critic_net_pallas(x_med, params))
    assert out_med.shape == (200, 1), out_med.shape
    ref_med = critic_net_ref(x_med, params, use_bf16_inputs=True)
    assert jnp.allclose(out_med, ref_med, atol=1e-4, rtol=1e-4), "mismatch (bf16 path, batch=200)"

    # Pure-f32 path sanity check (loose tol: XLA f32-matmul precision modes differ).
    out_f32 = jax.block_until_ready(
        critic_net_pallas(x_small, params, use_bf16_inputs=False))
    ref_f32 = critic_net_ref(x_small, params, use_bf16_inputs=False)
    assert jnp.allclose(out_f32, ref_f32, atol=2e-2, rtol=2e-2), "mismatch (f32 path)"

    print("KERNEL_OK")
</pallas_src>

<mosaic_0001>
module attributes {stable_mosaic.version = 11 : i64} {
  func.func @_critic_kernel(%arg0: i32, %arg1: memref<128x32xf32, #tpu.memory_space<vmem>>, %arg2: memref<128x32xbf16, #tpu.memory_space<vmem>>, %arg3: memref<128x1xf32, #tpu.memory_space<vmem>>, %arg4: memref<64x128xbf16, #tpu.memory_space<vmem>>, %arg5: memref<64x1xf32, #tpu.memory_space<vmem>>, %arg6: memref<64x1xf32, #tpu.memory_space<vmem>>, %arg7: memref<1x128xf32, #tpu.memory_space<vmem>>) attributes {dimension_semantics = [#tpu.dimension_semantics<parallel>], iteration_bounds = array<i64: 1>, scalar_prefetch = 0 : i64, scratch_operands = 0 : i64, tpu.core_type = #tpu.core_type<tc>, window_params = [{transform_indices = @transform_0, window_bounds = array<i64: 128, 32>}, {pipeline_mode = #tpu.pipeline_mode<synchronous>, transform_indices = @transform_1, window_bounds = array<i64: 128, 32>}, {pipeline_mode = #tpu.pipeline_mode<synchronous>, transform_indices = @transform_2, window_bounds = array<i64: 128, 1>}, {pipeline_mode = #tpu.pipeline_mode<synchronous>, transform_indices = @transform_3, window_bounds = array<i64: 64, 128>}, {pipeline_mode = #tpu.pipeline_mode<synchronous>, transform_indices = @transform_4, window_bounds = array<i64: 64, 1>}, {pipeline_mode = #tpu.pipeline_mode<synchronous>, transform_indices = @transform_5, window_bounds = array<i64: 64, 1>}, {transform_indices = @transform_6, window_bounds = array<i64: 1, 128>}]} {
    %c0 = arith.constant 0 : index
    %c0_0 = arith.constant 0 : index
    %0 = vector.load %arg1[%c0, %c0_0] : memref<128x32xf32, #tpu.memory_space<vmem>>, vector<128x32xf32>
    %1 = arith.truncf %0 : vector<128x32xf32> to vector<128x32xbf16>
    %c0_1 = arith.constant 0 : index
    %c0_2 = arith.constant 0 : index
    %2 = vector.load %arg2[%c0_1, %c0_2] : memref<128x32xbf16, #tpu.memory_space<vmem>>, vector<128x32xbf16>
    %cst = arith.constant dense<0.000000e+00> : vector<128x128xf32>
    %3 = tpu.matmul %2, %1, %cst {dimension_numbers = #tpu.dot_dimension_numbers<[1], [1], [0], [0], [0, 0, 1, 0], [], []>} : vector<128x32xbf16>, vector<128x32xbf16>, vector<128x128xf32> -> vector<128x128xf32>
    %c0_3 = arith.constant 0 : index
    %c0_4 = arith.constant 0 : index
    %4 = vector.load %arg3[%c0_3, %c0_4] : memref<128x1xf32, #tpu.memory_space<vmem>>, vector<128x1xf32>
    %5 = vector.broadcast %4 : vector<128x1xf32> to vector<128x128xf32>
    %6 = arith.addf %3, %5 : vector<128x128xf32>
    %cst_5 = arith.constant 0.000000e+00 : f32
    %7 = vector.broadcast %cst_5 : f32 to vector<128x128xf32>
    %8 = arith.maximumf %6, %7 : vector<128x128xf32>
    %c0_6 = arith.constant 0 : index
    %c0_7 = arith.constant 0 : index
    %9 = vector.load %arg4[%c0_6, %c0_7] : memref<64x128xbf16, #tpu.memory_space<vmem>>, vector<64x128xbf16>
    %10 = arith.truncf %8 : vector<128x128xf32> to vector<128x128xbf16>
    %cst_8 = arith.constant dense<0.000000e+00> : vector<64x128xf32>
    %11 = tpu.matmul %9, %10, %cst_8 {dimension_numbers = #tpu.dot_dimension_numbers<[1], [0], [0], [1], [0, 0, 1, 1], [], []>} : vector<64x128xbf16>, vector<128x128xbf16>, vector<64x128xf32> -> vector<64x128xf32>
    %c0_9 = arith.constant 0 : index
    %c0_10 = arith.constant 0 : index
    %12 = vector.load %arg5[%c0_9, %c0_10] : memref<64x1xf32, #tpu.memory_space<vmem>>, vector<64x1xf32>
    %13 = vector.broadcast %12 : vector<64x1xf32> to vector<64x128xf32>
    %14 = arith.addf %11, %13 : vector<64x128xf32>
    %cst_11 = arith.constant 0.000000e+00 : f32
    %15 = vector.broadcast %cst_11 : f32 to vector<64x128xf32>
    %16 = arith.maximumf %14, %15 : vector<64x128xf32>
    %c0_12 = arith.constant 0 : index
    %c0_13 = arith.constant 0 : index
    %17 = vector.load %arg6[%c0_12, %c0_13] : memref<64x1xf32, #tpu.memory_space<vmem>>, vector<64x1xf32>
    %18 = vector.broadcast %17 : vector<64x1xf32> to vector<64x128xf32>
    %19 = arith.mulf %16, %18 : vector<64x128xf32>
    %cst_14 = arith.constant dense<0.000000e+00> : vector<128xf32>
    %20 = vector.multi_reduction <add>, %19, %cst_14 [0] : vector<64x128xf32> to vector<128xf32>
    %21 = vector.shape_cast %20 : vector<128xf32> to vector<1x128xf32>
    %c0_15 = arith.constant 0 : index
    %c0_16 = arith.constant 0 : index
    %22 = vector.load %arg7[%c0_15, %c0_16] : memref<1x128xf32, #tpu.memory_space<vmem>>, vector<1x128xf32>
    tpu.vector_store %arg7[%c0_15, %c0_16], %21 {strides = array<i32>} : memref<1x128xf32, #tpu.memory_space<vmem>>, vector<1x128xf32>,
    return
  }
  func.func @transform_0(%arg0: i32) -> (i32, i32) {
    %c0_i32 = arith.constant 0 : i32
    %c0_i32_0 = arith.constant 0 : i32
    return %arg0, %c0_i32 : i32, i32
  }
  func.func @transform_1(%arg0: i32) -> (i32, i32) {
    %c0_i32 = arith.constant 0 : i32
    %c0_i32_0 = arith.constant 0 : i32
    %c0_i32_1 = arith.constant 0 : i32
    return %c0_i32, %c0_i32_0 : i32, i32
  }
  func.func @transform_2(%arg0: i32) -> (i32, i32) {
    %c0_i32 = arith.constant 0 : i32
    %c0_i32_0 = arith.constant 0 : i32
    %c0_i32_1 = arith.constant 0 : i32
    return %c0_i32, %c0_i32_0 : i32, i32
  }
  func.func @transform_3(%arg0: i32) -> (i32, i32) {
    %c0_i32 = arith.constant 0 : i32
    %c0_i32_0 = arith.constant 0 : i32
    %c0_i32_1 = arith.constant 0 : i32
    return %c0_i32, %c0_i32_0 : i32, i32
  }
  func.func @transform_4(%arg0: i32) -> (i32, i32) {
    %c0_i32 = arith.constant 0 : i32
    %c0_i32_0 = arith.constant 0 : i32
    %c0_i32_1 = arith.constant 0 : i32
    return %c0_i32, %c0_i32_0 : i32, i32
  }
  func.func @transform_5(%arg0: i32) -> (i32, i32) {
    %c0_i32 = arith.constant 0 : i32
    %c0_i32_0 = arith.constant 0 : i32
    %c0_i32_1 = arith.constant 0 : i32
    return %c0_i32, %c0_i32_0 : i32, i32
  }
  func.func @transform_6(%arg0: i32) -> (i32, i32) {
    %c0_i32 = arith.constant 0 : i32
    %c0_i32_0 = arith.constant 0 : i32
    return %c0_i32, %arg0 : i32, i32
  }
}

</mosaic_0001>

<bundles_post_ra>
// kernel: tpu_custom_call.1
= control target key start
LH: loop header
LB: loop body
LE: loop exit
PB: predicated region body
PF: predicated region fallthrough
CT: control target
= control target key end

     0   :  { %vm201_vm0 = vcmask 261120   ;;  %v758_v5 = vmov 0   ;;  %s1011_s0 = inlined_call_operand.vmem [shape: f32[8,32], index: 0, kind: input, shape index: {}]   ;;  %s1012_s1 = inlined_call_operand.vmem [shape: bf16[128,32], index: 1, kind: input, shape index: {}]   ;;  %s1013_s2 = inlined_call_operand.vmem [shape: f32[128,1], index: 2, kind: input, shape index: {}]   ;;  %s1014_s3 = inlined_call_operand.vmem [shape: bf16[64,128], index: 3, kind: input, shape index: {}]   ;;  %s1015_s4 = inlined_call_operand.vmem [shape: f32[64,1], index: 4, kind: input, shape index: {}]   ;;  %s1016_s5 = inlined_call_operand.vmem [shape: f32[64,1], index: 5, kind: input, shape index: {}]   ;;  %s1017_s6 = inlined_call_operand.hbm [shape: f32[1,128], index: 6, kind: output, shape index: {}]  }
   0x1   :  { %v39_v0 = vld [vmem:[%s1011_s0 + $0x70] sm:$0xff]  ;;  %v40_v1 = vld [vmem:[%s1011_s0 + $0x78] sm:$0xff]  ;;  %v37_v2 = vld [vmem:[%s1011_s0 + $0x60] sm:$0xff]  ;;  %722 = vset.pattern.permute.xlu0 %v758_v5  ;;  %723 = vset.pattern.permute.xlu1 %v758_v5 }
   0x2   :  { %v48_v3 = vpack.c.bf16 %v40_v1, %v39_v0  ;;  %v38_v4 = vld [vmem:[%s1011_s0 + $0x68] sm:$0xff]  ;;  %v35_v8 = vld [vmem:[%s1011_s0 + $0x50] sm:$0xff]  ;;  %v36_v9 = vld [vmem:[%s1011_s0 + $0x58] sm:$0xff] }
   0x3   :  { %v47_v6 = vpack.c.bf16 %v38_v4, %v37_v2  ;;  %v724_v10 = vld [vmem:[%s1012_s1] sm:$0xff]   ;;  %v46_v12 = vpack.c.bf16 %v36_v9, %v35_v8  ;;  %v79_v13 = vld [vmem:[%s1013_s2 + $0x70] sm:$0xff]  ;;  %v34_v15 = vld [vmem:[%s1011_s0 + $0x48] sm:$0xff] }
   0x4   :  { %712 = vmatprep.subr.msk.bf16.mxu0 %vm201_vm0, %v48_v3  ;;  %v248_v7 = vsel %vm201_vm0, %v48_v3, 0  ;;  %672 = vmatprep.mubr.msk.bf16.mxu0 %vm201_vm0, %v724_v10  ;;  %v33_v14 = vld [vmem:[%s1011_s0 + $0x40] sm:$0xff]  ;;  %v80_v17 = vld [vmem:[%s1013_s2 + $0x78] sm:$0xff]  ;;  %v78_v18 = vld [vmem:[%s1013_s2 + $0x68] sm:$0xff] }
   0x5   :  { %657 = vmatpush3.bf16.xpose.msra.mxu0 %v248_v7  ;;  %v245_v11 = vsel %vm201_vm0, %v47_v6, 0  ;;  %153 = vperm.xlu0 %722, %v79_v13   ;;  %v77_v16 = vld [vmem:[%s1013_s2 + $0x60] sm:$0xff]  ;;  %v242_v19 = vsel %vm201_vm0, %v46_v12, 0  ;;  %v45_v20 = vpack.c.bf16 %v34_v15, %v33_v14  ;;  %v75_v21 = vld [vmem:[%s1013_s2 + $0x50] sm:$0xff]  ;;  %v76_v22 = vld [vmem:[%s1013_s2 + $0x58] sm:$0xff] }
   0x6   :  { %713 = vmatprep.subr.msk.bf16.mxu0 %vm201_vm0, %v47_v6  ;;  %143 = vperm.xlu1 %723, %v77_v16   ;;  %v31_v23 = vld [vmem:[%s1011_s0 + $0x30] sm:$0xff]  ;;  %v32_v24 = vld [vmem:[%s1011_s0 + $0x38] sm:$0xff]  ;;  %v73_v26 = vld [vmem:[%s1013_s2 + $0x40] sm:$0xff] }
   0x7   :  { %v239_v25 = vsel %vm201_vm0, %v45_v20, 0  ;;  %v74_v27 = vld [vmem:[%s1013_s2 + $0x48] sm:$0xff]  ;;  %v44_v28 = vpack.c.bf16 %v32_v24, %v31_v23 }
   0x9   :  { %158 = vperm.xlu0 %722, %v80_v17  }
   0xa   :  { %148 = vperm.xlu1 %723, %v78_v18  }
   0xd   :  { %659 = vmatpush3.bf16.xpose.msra.mxu0 %v245_v11  ;;  %133 = vperm.xlu0 %722, %v75_v21  }
   0xe   :  { %714 = vmatprep.subr.msk.bf16.mxu0 %vm201_vm0, %v46_v12  ;;  %138 = vperm.xlu1 %723, %v76_v22  }
  0x11   :  { %123 = vperm.xlu0 %722, %v73_v26  }
  0x15   :  { %661 = vmatpush3.bf16.xpose.msra.mxu0 %v242_v19 }
  0x16   :  { %715 = vmatprep.subr.msk.bf16.mxu0 %vm201_vm0, %v45_v20 }
  0x17   :  { %11 = vsyncpa [#allocation3], 0  ;;  %128 = vperm.xlu1 %723, %v74_v27   ;;  %v71_v29 = vld [vmem:[%s1013_s2 + $0x30] sm:$0xff]  ;;  %v72_v30 = vld [vmem:[%s1013_s2 + $0x38] sm:$0xff]  ;;  %v236_v35 = vsel %vm201_vm0, %v44_v28, 0 }
  0x18   :  { %v29_v31 = vld [vmem:[%s1011_s0 + $0x20] sm:$0xff]  ;;  %v30_v32 = vld [vmem:[%s1011_s0 + $0x28] sm:$0xff]  ;;  %113 = vperm.xlu0 %722, %v71_v29   ;;  %v67_v37 = vld [vmem:[%s1013_s2 + $0x10] sm:$0xff] }
  0x19   :  { %v69_v33 = vld [vmem:[%s1013_s2 + $0x20] sm:$0xff]  ;;  %v70_v34 = vld [vmem:[%s1013_s2 + $0x28] sm:$0xff]  ;;  %v43_v36 = vpack.c.bf16 %v30_v32, %v29_v31  ;;  %v68_v38 = vld [vmem:[%s1013_s2 + $0x18] sm:$0xff] }
  0x1a   :  { %v27_v39 = vld [vmem:[%s1011_s0 + $0x10] sm:$0xff]  ;;  %v28_v40 = vld [vmem:[%s1011_s0 + $0x18] sm:$0xff]  ;;  %v65_v41 = vld [vmem:[%s1013_s2] sm:$0xff] }
  0x1b   :  { %118 = vperm.xlu1 %723, %v72_v30   ;;  %v66_v42 = vld [vmem:[%s1013_s2 + $0x8] sm:$0xff]  ;;  %v233_v43 = vsel %vm201_vm0, %v43_v36, 0  ;;  %v42_v44 = vpack.c.bf16 %v28_v40, %v27_v39  ;;  %v379_v45 = vld [vmem:[%s1015_s4] sm:$0xff]  ;;  %v381_v49 = vld [vmem:[%s1015_s4 + $0x10] sm:$0xff] }
  0x1c   :  { %103 = vperm.xlu0 %722, %v69_v33   ;;  %v380_v46 = vld [vmem:[%s1015_s4 + $0x8] sm:$0xff]  ;;  %v25_v47 = vld [vmem:[%s1011_s0] sm:$0xff]  ;;  %v382_v50 = vld [vmem:[%s1015_s4 + $0x18] sm:$0xff] }
  0x1d   :  { %663 = vmatpush3.bf16.xpose.msra.mxu0 %v239_v25  ;;  %v26_v48 = vld [vmem:[%s1011_s0 + $0x8] sm:$0xff]  ;;  %v230_v51 = vsel %vm201_vm0, %v42_v44, 0  ;;  %v524_v53 = vld [vmem:[%s1016_s5] sm:$0xff]  ;;  %v526_v56 = vld [vmem:[%s1016_s5 + $0x10] sm:$0xff] }
  0x1e   :  { %716 = vmatprep.subr.msk.bf16.mxu0 %vm201_vm0, %v44_v28  ;;  %v41_v52 = vpack.c.bf16 %v26_v48, %v25_v47  ;;  %v525_v54 = vld [vmem:[%s1016_s5 + $0x8] sm:$0xff]  ;;  %v383_v55 = vld [vmem:[%s1015_s4 + $0x20] sm:$0xff]  ;;  %v527_v59 = vld [vmem:[%s1016_s5 + $0x18] sm:$0xff] }
  0x1f   :  { %108 = vperm.xlu1 %723, %v70_v34   ;;  %v384_v58 = vld [vmem:[%s1015_s4 + $0x28] sm:$0xff]  ;;  %v385_v61 = vld [vmem:[%s1015_s4 + $0x30] sm:$0xff]  ;;  %v528_v63 = vld [vmem:[%s1016_s5 + $0x20] sm:$0xff] }
  0x20   :  { %93 = vperm.xlu0 %722, %v67_v37   ;;  %v227_v57 = vsel %vm201_vm0, %v41_v52, 0  ;;  %v725_v60 = vld [vmem:[%s1012_s1 + $0x8] sm:$0xff]   ;;  %v726_v62 = vld [vmem:[%s1012_s1 + $0x10] sm:$0xff]   ;;  %v386_v0 = vld [vmem:[%s1015_s4 + $0x38] sm:$0xff] }
  0x21   :  { %v529_v1 = vld [vmem:[%s1016_s5 + $0x28] sm:$0xff]  ;;  %v727_v2 = vld [vmem:[%s1012_s1 + $0x18] sm:$0xff]   ;;  %v530_v3 = vld [vmem:[%s1016_s5 + $0x30] sm:$0xff] }
  0x22   :  { %v728_v4 = vld [vmem:[%s1012_s1 + $0x20] sm:$0xff]   ;;  %v531_v5 = vld [vmem:[%s1016_s5 + $0x38] sm:$0xff]  ;;  %v729_v6 = vld [vmem:[%s1012_s1 + $0x28] sm:$0xff]  }
  0x23   :  { %98 = vperm.xlu1 %723, %v68_v38   ;;  %v730_v7 = vld [vmem:[%s1012_s1 + $0x30] sm:$0xff]   ;;  %v731_v8 = vld [vmem:[%s1012_s1 + $0x38] sm:$0xff]   ;;  %v732_v9 = vld [vmem:[%s1014_s3] sm:$0xff]  }
  0x24   :  { %83 = vperm.xlu0 %722, %v65_v41   ;;  %704 = vmatprep.mubr.bf16.mxu1 %v732_v9 }
  0x25   :  { %665 = vmatpush3.bf16.xpose.msra.mxu0 %v236_v35 }
  0x26   :  { %717 = vmatprep.subr.msk.bf16.mxu0 %vm201_vm0, %v43_v36 }
  0x27   :  { %88 = vperm.xlu1 %723, %v66_v42  }
  0x28   :  { %389 = vperm.xlu0 %722, %v379_v45  }
  0x2b   :  { %394 = vperm.xlu1 %723, %v380_v46  }
  0x2c   :  { %399 = vperm.xlu0 %722, %v381_v49  }
  0x2d   :  { %667 = vmatpush3.bf16.xpose.msra.mxu0 %v233_v43 }
  0x2e   :  { %718 = vmatprep.subr.msk.bf16.mxu0 %vm201_vm0, %v42_v44 }
  0x2f   :  { %404 = vperm.xlu1 %723, %v382_v50  }
  0x30   :  { %534 = vperm.xlu0 %722, %v524_v53  }
  0x33   :  { %539 = vperm.xlu1 %723, %v525_v54  }
  0x34   :  { %409 = vperm.xlu0 %722, %v383_v55  }
  0x35   :  { %669 = vmatpush3.bf16.xpose.msra.mxu0 %v230_v51 }
  0x36   :  { %719 = vmatprep.subr.msk.bf16.mxu0 %vm201_vm0, %v41_v52 }
  0x37   :  { %544 = vperm.xlu1 %723, %v526_v56  }
  0x38   :  { %414 = vperm.xlu0 %722, %v384_v58  }
  0x3b   :  { %549 = vperm.xlu1 %723, %v527_v59  }
  0x3c   :  { %419 = vperm.xlu0 %722, %v385_v61  }
  0x3d   :  { %671 = vmatpush3.bf16.xpose.msra.mxu0 %v227_v57 }
  0x3f   :  { %554 = vperm.xlu1 %723, %v528_v63  }
  0x40   :  { %424 = vperm.xlu0 %722, %v386_v0  }
  0x43   :  { %559 = vperm.xlu1 %723, %v529_v1  }
  0x44   :  { %673 = vmatmul.mubr.msk.bf16.vlgmr.msra.gmra.mxu0 %vm201_vm0, %v725_v60  ;;  %564 = vperm.xlu0 %722, %v530_v3  }
  0x45   :  { %676 = vmatprep.mubr.msk.bf16.mxu0 %vm201_vm0, %v726_v62 }
  0x47   :  { %569 = vperm.xlu1 %723, %v531_v5  }
  0x4c   :  { %677 = vmatmul.mubr.msk.bf16.gmra.mxu0 %vm201_vm0, %v727_v2 }
  0x4d   :  { %680 = vmatprep.mubr.msk.bf16.mxu0 %vm201_vm0, %v728_v4 }
  0x54   :  { %681 = vmatmul.mubr.msk.bf16.gmra.mxu0 %vm201_vm0, %v729_v6 }
  0x55   :  { %684 = vmatprep.mubr.msk.bf16.mxu0 %vm201_vm0, %v730_v7 }
  0x5c   :  { %685 = vmatmul.mubr.msk.bf16.gmra.mxu0 %vm201_vm0, %v731_v8 }
  0x80   :  { %v154_v16 = vpop.permute.xlu0 %153 }
  0x81   :  { %v144_v14 = vpop.permute.xlu1 %143 }
  0x84   :  { %v159_v21 = vpop.permute.xlu0 %158 }
  0x85   :  { %v149_v19 = vpop.permute.xlu1 %148 }
  0x88   :  { %v134_v26 = vpop.permute.xlu0 %133 }
  0x89   :  { %v139_v24 = vpop.permute.xlu1 %138 }
  0x8c   :  { %v124_v32 = vpop.permute.xlu0 %123 }
  0x92   :  { %v129_v29 = vpop.permute.xlu1 %128 }
  0x93   :  { %v114_v46 = vpop.permute.xlu0 %113 }
  0x96   :  { %v119_v41 = vpop.permute.xlu1 %118 }
  0x97   :  { %v104_v56 = vpop.permute.xlu0 %103 }
  0x9a   :  { %v109_v52 = vpop.permute.xlu1 %108 }
  0x9b   :  { %v94_v1 = vpop.permute.xlu0 %93 }
  0x9e   :  { %v99_v62 = vpop.permute.xlu1 %98 }
  0xa2   :  { %v89_v7 = vpop.permute.xlu1 %88 }
 0x104   :  { %v990_v10 = vpop.f32.mrf.mxu0 }
 0x105   :  { %v293_v5 = vadd.f32 %v990_v10, %v94_v1  ;;  %v733_v10 = vld [vmem:[%s1014_s3 + $0x8] sm:$0xff]  }
 0x106   :  { %v992_v11 = vpop.f32.mrf.mxu0 }
 0x108   :  { %v675_v12 = vpop.f32.mrf.mxu0 }
 0x109   :  { %v296_v2 = vadd.f32 %v675_v12, %v99_v62 }
 0x10a   :  { %v994_v13 = vpop.f32.mrf.mxu0 }
 0x10b   :  { %v350_v8 = vmax.f32 %v296_v2, 0.0  ;;  %v288_v9 = vadd.f32 %v994_v13, %v89_v7  ;;  %v734_v13 = vld [vmem:[%s1014_s3 + $0x10] sm:$0xff]  }
 0x10c   :  { %v678_v15 = vpop.f32.mrf.mxu0 }
 0x10d   :  { %v309_v57 = vadd.f32 %v678_v15, %v114_v46  ;;  %v84_v15 = vpop.permute.xlu0 %83  ;;  %v348_v12 = vmax.f32 %v288_v9, 0.0 }
 0x10e   :  { %v300_v17 = vpop.f32.mrf.mxu0 }
 0x10f   :  { %v353_v63 = vmax.f32 %v309_v57, 0.0  ;;  %v301_v0 = vadd.f32 %v300_v17, %v104_v56  ;;  %v285_v17 = vadd.f32 %v992_v11, %v84_v15  ;;  %v735_v11 = vld [vmem:[%s1014_s3 + $0x18] sm:$0xff]   ;;  %s759_s3 = smov [#allocation2]  }
 0x110   :  { %v679_v18 = vpop.f32.mrf.mxu0  ;;  %s600_s14 = sshll.u32 %s759_s3, 4  ;;  %s601_s14 = int_to_ptr.vmem [resolvable:$true] %s600_s14 }
 0x111   :  { %v312_v53 = vadd.f32 %v679_v18, %v119_v41  ;;  %v351_v6 = vmax.f32 %v301_v0, 0.0  ;;  %s736_s15 = scalar_lea.vmem %s601_s14, 16  ;;  %s740_s16 = scalar_lea.vmem %s601_s14, 32 }
 0x112   :  { %v303_v20 = vpop.f32.mrf.mxu0  ;;  %p737_p0 = scmp.ne.s32.totalorder %s601_s14, %s736_s15  ;;  %p741_p1 = scmp.lt.s32.totalorder %s601_s14, %s601_s14 }
 0x113   :  { %v354_v59 = vmax.f32 %v312_v53, 0.0  ;;  %v304_v60 = vadd.f32 %v303_v20, %v109_v52  ;;  %p742_p2 = scmp.lt.s32.totalorder %s740_s16, %s736_s15 }
 0x114   :  { %v682_v22 = vpop.f32.mrf.mxu0 }
 0x115   :  { %v325_v42 = vadd.f32 %v682_v22, %v134_v26  ;;  %v374_v3 = vpack.c.bf16 %v354_v59, %v353_v63  ;;  %v352_v4 = vmax.f32 %v304_v60, 0.0  ;;  %v395_v22 = vpop.permute.xlu1 %394  ;;  %p743_p3 = por %p742_p2, %p741_p1 }
 0x116   :  { %v316_v23 = vpop.f32.mrf.mxu0 }
 0x117   :  { %v357_v50 = vmax.f32 %v325_v42, 0.0  ;;  %v317_v51 = vadd.f32 %v316_v23, %v124_v32  ;;  %p744_p4 = pnand %p743_p3, %p737_p0 }
 0x118   :  { %v683_v25 = vpop.f32.mrf.mxu0 }
 0x119   :  { %v328_v37 = vadd.f32 %v683_v25, %v139_v24  ;;  %v355_v58 = vmax.f32 %v317_v51, 0.0  ;;  %v405_v24 = vpop.permute.xlu1 %404 }
 0x11a   :  { %v319_v27 = vpop.f32.mrf.mxu0 }
 0x11b   :  { %v358_v47 = vmax.f32 %v328_v37, 0.0  ;;  %v320_v48 = vadd.f32 %v319_v27, %v129_v29 }
 0x11c   :  { %v686_v28 = vpop.f32.mrf.mxu0 }
 0x11d   :  { %v341_v31 = vadd.f32 %v686_v28, %v154_v16  ;;  %v376_v54 = vpack.c.bf16 %v358_v47, %v357_v50  ;;  %v356_v55 = vmax.f32 %v320_v48, 0.0  ;;  %v349_v16 = vmax.f32 %v293_v5, 0.0  ;;  %v540_v26 = vpop.permute.xlu1 %539 }
 0x11e   :  { %v332_v30 = vpop.f32.mrf.mxu0 }
 0x11f   :  { %v333_v34 = vadd.f32 %v332_v30, %v144_v14  ;;  %v361_v38 = vmax.f32 %v341_v31, 0.0  ;;  %v375_v61 = vpack.c.bf16 %v356_v55, %v355_v58  ;;  %v373_v14 = vpack.c.bf16 %v352_v4, %v351_v6 }
 0x120   :  { %v687_v33 = vpop.f32.mrf.mxu0  ;;  %v372_v18 = vpack.c.bf16 %v350_v8, %v349_v16 }
 0x121   :  { %v344_v35 = vadd.f32 %v687_v33, %v159_v21  ;;  %v359_v43 = vmax.f32 %v333_v34, 0.0  ;;  %v390_v21 = vpop.permute.xlu0 %389  ;;  %v545_v28 = vpop.permute.xlu1 %544 }
 0x122   :  { %v335_v36 = vpop.f32.mrf.mxu0 }
 0x123   :  { %v362_v39 = vmax.f32 %v344_v35, 0.0  ;;  %v336_v40 = vadd.f32 %v335_v36, %v149_v19  ;;  %v347_v19 = vmax.f32 %v285_v17, 0.0 }
 0x125   :  { %v360_v44 = vmax.f32 %v336_v40, 0.0  ;;  %v378_v45 = vpack.c.bf16 %v362_v39, %v361_v38  ;;  %v371_v20 = vpack.c.bf16 %v348_v12, %v347_v19  ;;  %v400_v23 = vpop.permute.xlu0 %399  ;;  %v550_v33 = vpop.permute.xlu1 %549 }
 0x127   :  { %v377_v49 = vpack.c.bf16 %v360_v44, %v359_v43  ;;  %688 = vmatprep.subr.bf16.mxu1 %v378_v45 }
 0x128   :  { %689 = vmatpush3.bf16.msra.mxu1 %v378_v45 }
 0x129   :  { %690 = vmatprep.subr.bf16.mxu1 %v377_v49  ;;  %v535_v25 = vpop.permute.xlu0 %534  ;;  %v555_v44 = vpop.permute.xlu1 %554 }
 0x12c   :  { %691 = vmatpush3.bf16.msra.mxu1 %v377_v49 }
 0x12d   :  { %692 = vmatprep.subr.bf16.mxu1 %v376_v54  ;;  %v410_v27 = vpop.permute.xlu0 %409 }
 0x130   :  { %693 = vmatpush3.bf16.msra.mxu1 %v376_v54 }
 0x131   :  { %694 = vmatprep.subr.bf16.mxu1 %v375_v61  ;;  %v415_v30 = vpop.permute.xlu0 %414 }
 0x134   :  { %695 = vmatpush3.bf16.msra.mxu1 %v375_v61  ;;  %v560_v61 = vpop.permute.xlu1 %559 }
 0x135   :  { %696 = vmatprep.subr.bf16.mxu1 %v374_v3  ;;  %v420_v40 = vpop.permute.xlu0 %419 }
 0x138   :  { %697 = vmatpush3.bf16.msra.mxu1 %v374_v3  ;;  %v570_v8 = vpop.permute.xlu1 %569 }
 0x139   :  { %698 = vmatprep.subr.bf16.mxu1 %v373_v14  ;;  %v425_v55 = vpop.permute.xlu0 %424 }
 0x13c   :  { %699 = vmatpush3.bf16.msra.mxu1 %v373_v14 }
 0x13d   :  { %700 = vmatprep.subr.bf16.mxu1 %v372_v18  ;;  %v565_v5 = vpop.permute.xlu0 %564 }
 0x140   :  { %701 = vmatpush3.bf16.msra.mxu1 %v372_v18 }
 0x141   :  { %702 = vmatprep.subr.bf16.mxu1 %v371_v20 }
 0x144   :  { %703 = vmatpush3.bf16.msra.mxu1 %v371_v20 }
 0x147   :  { %705 = vmatmul.mubr.bf16.vlgmr.msra.gmra.mxu1 %v733_v10 }
 0x148   :  { %708 = vmatprep.mubr.bf16.mxu1 %v734_v13 }
 0x14f   :  { %709 = vmatmul.mubr.bf16.gmra.mxu1 %v735_v11 }
 0x207   :  { %v706_v29 = vpop.f32.mrf.mxu1 }
 0x208   :  { %v494_v35 = vadd.f32 %v706_v29, %v400_v23 }
 0x209   :  { %v485_v31 = vpop.f32.mrf.mxu1 }
 0x20a   :  { %v486_v32 = vadd.f32 %v485_v31, %v390_v21  ;;  %v518_v42 = vmax.f32 %v494_v35, 0.0 }
 0x20b   :  { %v707_v34 = vpop.f32.mrf.mxu1 }
 0x20c   :  { %v516_v37 = vmax.f32 %v486_v32, 0.0  ;;  %v497_v38 = vadd.f32 %v707_v34, %v405_v24  ;;  %v574_v51 = vmul.f32 %v545_v28, %v518_v42 }
 0x20d   :  { %v488_v36 = vpop.f32.mrf.mxu1 }
 0x20e   :  { %v489_v39 = vadd.f32 %v488_v36, %v395_v22  ;;  %v572_v46 = vmul.f32 %v535_v25, %v516_v37  ;;  %v519_v47 = vmax.f32 %v497_v38, 0.0 }
 0x20f   :  { %v710_v41 = vpop.f32.mrf.mxu1 }
 0x210   :  { %v517_v43 = vmax.f32 %v489_v39, 0.0  ;;  %v510_v53 = vadd.f32 %v710_v41, %v420_v40  ;;  %v575_v57 = vmul.f32 %v550_v33, %v519_v47 }
 0x211   :  { %v501_v45 = vpop.f32.mrf.mxu1 }
 0x212   :  { %v573_v48 = vmul.f32 %v540_v26, %v517_v43  ;;  %v502_v49 = vadd.f32 %v501_v45, %v410_v27  ;;  %v522_v62 = vmax.f32 %v510_v53, 0.0 }
 0x213   :  { %v711_v50 = vpop.f32.mrf.mxu1 }
 0x214   :  { %v580_v52 = vadd.f32 %v573_v48, %v572_v46  ;;  %v520_v54 = vmax.f32 %v502_v49, 0.0  ;;  %v513_v59 = vadd.f32 %v711_v50, %v425_v55  ;;  %v578_v6 = vmul.f32 %v565_v5, %v522_v62 }
 0x215   :  { %v504_v56 = vpop.f32.mrf.mxu1 }
 0x216   :  { %v581_v58 = vadd.f32 %v580_v52, %v574_v51  ;;  %v505_v60 = vadd.f32 %v504_v56, %v415_v30  ;;  %v576_v63 = vmul.f32 %v555_v44, %v520_v54  ;;  %v523_v3 = vmax.f32 %v513_v59, 0.0 }
 0x218   :  { %v582_v0 = vadd.f32 %v581_v58, %v575_v57  ;;  %v521_v1 = vmax.f32 %v505_v60, 0.0  ;;  %v579_v9 = vmul.f32 %v570_v8, %v523_v3 }
 0x21a   :  { %v583_v2 = vadd.f32 %v582_v0, %v576_v63  ;;  %v577_v4 = vmul.f32 %v560_v61, %v521_v1 }
 0x21c   :  { %v584_v7 = vadd.f32 %v583_v2, %v577_v4 }
 0x21e   :  { %v585_v14 = vadd.f32 %v584_v7, %v578_v6 }
 0x220   :  { %v586_v15 = vadd.f32 %v585_v14, %v579_v9 }
 0x222   :  { %v587_v16 = vrot.slane %v586_v15, 4 }
 0x224   :  { %v588_v17 = vadd.f32 %v587_v16, %v586_v15 }
 0x226   :  { %v589_v18 = vrot.slane %v588_v17, 2 }
 0x228   :  { %v590_v12 = vadd.f32 %v589_v18, %v588_v17 }
 0x22a   :  { %v591_v19 = vrot.slane %v590_v12, 1 }
 0x22c   :  { %v592_v20 = vadd.f32 %v591_v19, %v590_v12 }
 0x22e   :  { %593 = vst [vmem:[#allocation2] sm:$0x1] %v592_v20 }
 0x22f   :  { %747 = shalt.err (!%p744_p4)
}
 0x230   :  { %603 = dma.vmem_to_hbm [thread:$0]  %s601_s14, 16, %s1017_s6, [#allocation3]  }
 0x231   :  { %756 = dma.done.wait [#allocation3], 16  }
 0x232   :  { %757 = vsyncadd [#allocation3], 4294967280 }
 0x233   :  { %607 = vsyncpa [#allocation3], 1 }

</bundles_post_ra>
